<compile_context>
chip_gen: v5e
topology: v5e:2x2
jax: 0.10.0
libtpu: 0.0.40
codegen_flags: <defaults>
</compile_context>

<pallas_src>
import functools

import jax
import jax.numpy as jnp
from jax.experimental import pallas as pl
from jax.experimental.pallas import tpu as pltpu

_LANE = 128


def _round_up(x, m):
    return (x + m - 1) // m * m


def _vmem_capacity_bytes():
    """Physical per-core VMEM; falls back to 128 MiB (v5e/v6e) if unknown."""
    try:
        info = pltpu.get_tpu_info()
        for name in ("vmem_capacity_bytes", "vmem_bytes", "vmem_size_bytes"):
            cap = getattr(info, name, None)
            if cap:
                return int(cap)
    except Exception:
        pass
    return 128 * 1024 * 1024


# ---------------------------------------------------------------------------
# Kernels
# ---------------------------------------------------------------------------
def _link_kernel_nok(a_ref, wt_ref, b_ref, o_ref):
    """Whole-K path: one MXU matmul per row block, bias added once.

    a_ref: (tm, n_pad) int8, wt_ref: (n_pad, c_pad) bf16 (resident),
    b_ref: (1, c_pad) f32, o_ref: (tm, c_pad) f32.
    """
    a = a_ref[...].astype(jnp.bfloat16)          # int8 {0,1} -> exact bf16
    o_ref[...] = (
        jnp.dot(a, wt_ref[...], preferred_element_type=jnp.float32) + b_ref[...]
    )


def _link_kernel_tiled(a_ref, wt_ref, b_ref, o_ref, *, tk, resident_wt):
    """Tiled reduce-over-K path; accumulates directly into the f32 output block.

    a_ref: (tm, tk) int8.
    wt_ref: (n_pad, c_pad) bf16 resident (sliced per k)  OR  (tk, c_pad) streamed.
    b_ref: (1, c_pad) f32, o_ref: (tm, c_pad) f32 (resident across k).
    """
    k = pl.program_id(1)

    @pl.when(k == 0)
    def _():
        o_ref[...] = jnp.broadcast_to(b_ref[...], o_ref.shape)

    a = a_ref[...].astype(jnp.bfloat16)
    if resident_wt:
        off = pl.multiple_of(k * tk, tk)
        w = wt_ref[pl.ds(off, tk), :]
    else:
        w = wt_ref[...]
    o_ref[...] += jnp.dot(a, w, preferred_element_type=jnp.float32)


# ---------------------------------------------------------------------------
# Tiling plan (per-step working-set accounting, bytes)
# ---------------------------------------------------------------------------
def _bytes_nok(tm, n_pad, c_pad):
    return (2 * tm * n_pad            # A tile (int8, double-buffered)
            + tm * n_pad * 2          # in-kernel bf16 cast of the A tile
            + 2 * n_pad * c_pad * 2   # resident Wt (bf16, 2 pipeline buffers)
            + 2 * c_pad * 4           # bias
            + 2 * tm * c_pad * 4)     # output tile (f32)


def _bytes_resident(tm, tk, n_pad, c_pad):
    return (2 * tm * tk + tm * tk * 2 + 2 * n_pad * c_pad * 2
            + 2 * c_pad * 4 + 2 * tm * c_pad * 4)


def _bytes_stream(tm, tk, n_pad, c_pad):
    return (2 * tm * tk + tm * tk * 2 + 2 * tk * c_pad * 2
            + 2 * c_pad * 4 + 2 * tm * c_pad * 4)


def _plan_bytes(plan, n_pad, c_pad):
    kind, tm, tk = plan
    if kind == "noK":
        return _bytes_nok(tm, n_pad, c_pad)
    if kind == "resident":
        return _bytes_resident(tm, tk, n_pad, c_pad)
    return _bytes_stream(tm, tk, n_pad, c_pad)


def _plan(n_pad, c_pad, budget, force_plan=None):
    """Returns (kind, tm, tk) with kind in {"noK", "resident", "stream"}."""
    if force_plan is not None:
        return force_plan

    cands = [t for t in (512, 256, 128) if n_pad % t == 0]
    # Prefer >= 2 row blocks so the "parallel" axis can shard across 2 TCs (v7x).
    multi = [t for t in cands if n_pad // t >= 2]
    tms = multi if multi else cands
    tks = [t for t in (4096, 2048, 1024, 512, 256, 128) if n_pad % t == 0]

    for tm in tms:                                   # best: no K grid at all
        if _bytes_nok(tm, n_pad, c_pad) <= budget:
            return ("noK", tm, None)
    for tm in tms:                                   # next: resident Wt, big tk
        for tk in tks:
            if _bytes_resident(tm, tk, n_pad, c_pad) <= budget:
                return ("resident", tm, tk)
    for tm in tms:                                   # fallback: stream Wt per k
        for tk in tks:
            if _bytes_stream(tm, tk, n_pad, c_pad) <= budget:
                return ("stream", tm, tk)
    return ("stream", 128, 128)


# ---------------------------------------------------------------------------
# Forward
# ---------------------------------------------------------------------------
def link_forward(A, W, b, *, num_nodes=None, force_plan=None):
    """logits = A @ W.T + b  (nn.Linear applied to the dense adjacency).

    A: (N, N) or already-padded (n_pad, n_pad) adjacency with values {0, 1}.
    W: (C, N) linear weight (PyTorch nn.Linear convention), b: (C,) bias.
    Returns (N, C) float32 logits.
    """
    C, N_w = W.shape
    N = int(num_nodes) if num_nodes is not None else int(A.shape[0])
    assert N_w == N and b.shape == (C,)

    n_pad = _round_up(max(N, _LANE), _LANE)
    c_pad = _round_up(max(C, _LANE), _LANE)

    # A stored as int8 ({0,1} exact). Skip the pad copy when already padded.
    if A.shape == (n_pad, n_pad):
        A_p = A if A.dtype == jnp.int8 else A.astype(jnp.int8)
    else:
        assert A.shape[0] == A.shape[1] and A.shape[0] <= n_pad
        A_p = jnp.zeros((n_pad, n_pad), jnp.int8).at[:A.shape[0], :A.shape[1]].set(
            A.astype(jnp.int8))

    Wt_p = jnp.zeros((n_pad, c_pad), jnp.bfloat16).at[:N, :C].set(
        W.T.astype(jnp.bfloat16))
    b_p = jnp.zeros((1, c_pad), jnp.float32).at[0, :C].set(b.astype(jnp.float32))

    capacity = _vmem_capacity_bytes()
    budget = capacity * 5 // 8          # ~80 MiB on v5e/v6e, ~40 MiB on v7x
    plan = _plan(n_pad, c_pad, budget, force_plan)
    kind, tm, tk = plan
    vmem_limit = int(min(max(_plan_bytes(plan, n_pad, c_pad) + (8 << 20), 32 << 20),
                         capacity * 9 // 10))

    cost = pl.CostEstimate(
        flops=2 * n_pad * n_pad * c_pad,
        transcendentals=0,
        bytes_accessed=(n_pad * n_pad            # A (int8)
                        + 2 * n_pad * c_pad      # Wt (bf16)
                        + 4 * c_pad              # bias
                        + 4 * n_pad * c_pad),    # output (f32)
    )

    if kind == "noK":
        out = pl.pallas_call(
            _link_kernel_nok,
            out_shape=jax.ShapeDtypeStruct((n_pad, c_pad), jnp.float32),
            grid_spec=pltpu.PrefetchScalarGridSpec(
                num_scalar_prefetch=0,
                grid=(n_pad // tm,),
                in_specs=[
                    pl.BlockSpec((tm, n_pad), lambda i: (i, 0)),      # A row slab
                    pl.BlockSpec((n_pad, c_pad), lambda i: (0, 0)),   # Wt resident
                    pl.BlockSpec((1, c_pad), lambda i: (0, 0)),       # bias resident
                ],
                out_specs=pl.BlockSpec((tm, c_pad), lambda i: (i, 0)),
            ),
            compiler_params=pltpu.CompilerParams(
                dimension_semantics=("parallel",),
                vmem_limit_bytes=vmem_limit,
            ),
            cost_estimate=cost,
        )(A_p, Wt_p, b_p)
    else:
        resident = (kind == "resident")
        wt_spec = (pl.BlockSpec((n_pad, c_pad), lambda i, k: (0, 0)) if resident
                   else pl.BlockSpec((tk, c_pad), lambda i, k: (k, 0)))
        out = pl.pallas_call(
            functools.partial(_link_kernel_tiled, tk=tk, resident_wt=resident),
            out_shape=jax.ShapeDtypeStruct((n_pad, c_pad), jnp.float32),
            grid_spec=pltpu.PrefetchScalarGridSpec(
                num_scalar_prefetch=0,
                grid=(n_pad // tm, n_pad // tk),
                in_specs=[
                    pl.BlockSpec((tm, tk), lambda i, k: (i, k)),      # A tile
                    wt_spec,                                          # Wt
                    pl.BlockSpec((1, c_pad), lambda i, k: (0, 0)),    # bias resident
                ],
                out_specs=pl.BlockSpec((tm, c_pad), lambda i, k: (i, 0)),
            ),
            compiler_params=pltpu.CompilerParams(
                dimension_semantics=("parallel", "arbitrary"),
                vmem_limit_bytes=vmem_limit,
            ),
            cost_estimate=cost,
        )(A_p, Wt_p, b_p)

    return out[:N, :C]


# ---------------------------------------------------------------------------
# Glue: dense {0,1} adjacency from edge_index, built directly at padded size
# in int8 so link_forward never re-pads / re-copies it.
# ---------------------------------------------------------------------------
def build_dense_adjacency(edge_index, num_nodes, *, padded_size=None):
    # Note: duplicate edges collapse to 1 (unweighted adjacency).
    row, col = edge_index
    n = num_nodes if padded_size is None else padded_size
    A = jnp.zeros((n, n), dtype=jnp.int8)
    return A.at[row, col].set(1)


def _ref_logits(A, W, b):
    # Reference with W rounded to bf16 (matching kernel weight precision) but
    # all arithmetic in f32.
    Wq = W.astype(jnp.bfloat16).astype(jnp.float32)
    return A.astype(jnp.float32) @ Wq.T + b.astype(jnp.float32)


if __name__ == "__main__":
    key = jax.random.PRNGKey(0)
    (k_row, k_col, k_w, k_b, k_row2, k_col2, k_w2, k_b2) = jax.random.split(key, 8)

    # ---- Test 1: small demo graph -> whole-K (noK) path ----
    num_nodes, out_channels, num_edges = 128, 32, 512
    row = jax.random.randint(k_row, (num_edges,), 0, num_nodes, dtype=jnp.int32)
    col = jax.random.randint(k_col, (num_edges,), 0, num_nodes, dtype=jnp.int32)
    W = jax.random.normal(k_w, (out_channels, num_nodes), dtype=jnp.float32) * 0.05
    b = jax.random.normal(k_b, (out_channels,), dtype=jnp.float32) * 0.01

    n_pad1 = _round_up(num_nodes, _LANE)
    A = build_dense_adjacency((row, col), num_nodes, padded_size=n_pad1)
    logits = jax.block_until_ready(link_forward(A, W, b, num_nodes=num_nodes))
    A_log = A[:num_nodes, :num_nodes]
    ref = _ref_logits(A_log, W, b)
    ref_f32 = A_log.astype(jnp.float32) @ W.T + b
    assert logits.shape == (num_nodes, out_channels)
    assert jnp.allclose(logits, ref, atol=1e-4, rtol=1e-4), "mismatch (noK path)"
    assert jnp.allclose(logits, ref_f32, atol=5e-2, rtol=5e-2), "gross mismatch (noK)"

    # ---- Test 2: larger graph, force resident-Wt and streaming-Wt tiled paths ----
    num_nodes2, num_edges2 = 512, 4096
    row2 = jax.random.randint(k_row2, (num_edges2,), 0, num_nodes2, dtype=jnp.int32)
    col2 = jax.random.randint(k_col2, (num_edges2,), 0, num_nodes2, dtype=jnp.int32)
    W2 = jax.random.normal(k_w2, (out_channels, num_nodes2), dtype=jnp.float32) * 0.05
    b2 = jax.random.normal(k_b2, (out_channels,), dtype=jnp.float32) * 0.01

    A2 = build_dense_adjacency((row2, col2), num_nodes2)   # 512 is already padded
    ref2 = _ref_logits(A2, W2, b2)
    for fp in (("resident", 256, 128), ("stream", 256, 256)):
        logits2 = jax.block_until_ready(
            link_forward(A2, W2, b2, num_nodes=num_nodes2, force_plan=fp))
        assert logits2.shape == (num_nodes2, out_channels)
        assert jnp.allclose(logits2, ref2, atol=1e-4, rtol=1e-4), f"mismatch ({fp})"

    print("KERNEL_OK")
</pallas_src>

<mosaic_0001>
module attributes {stable_mosaic.version = 11 : i64} {
  func.func @_link_kernel_nok(%arg0: i32, %arg1: memref<128x128xi8, #tpu.memory_space<vmem>>, %arg2: memref<128x128xbf16, #tpu.memory_space<vmem>>, %arg3: memref<1x128xf32, #tpu.memory_space<vmem>>, %arg4: memref<128x128xf32, #tpu.memory_space<vmem>>) attributes {dimension_semantics = [#tpu.dimension_semantics<parallel>], iteration_bounds = array<i64: 1>, scalar_prefetch = 0 : i64, scratch_operands = 0 : i64, tpu.core_type = #tpu.core_type<tc>, window_params = [{transform_indices = @transform_0, window_bounds = array<i64: 128, 128>}, {pipeline_mode = #tpu.pipeline_mode<synchronous>, transform_indices = @transform_1, window_bounds = array<i64: 128, 128>}, {pipeline_mode = #tpu.pipeline_mode<synchronous>, transform_indices = @transform_2, window_bounds = array<i64: 1, 128>}, {transform_indices = @transform_3, window_bounds = array<i64: 128, 128>}]} {
    %c0 = arith.constant 0 : index
    %c0_0 = arith.constant 0 : index
    %0 = vector.load %arg1[%c0, %c0_0] : memref<128x128xi8, #tpu.memory_space<vmem>>, vector<128x128xi8>
    %1 = arith.sitofp %0 : vector<128x128xi8> to vector<128x128xbf16>
    %c0_1 = arith.constant 0 : index
    %c0_2 = arith.constant 0 : index
    %2 = vector.load %arg2[%c0_1, %c0_2] : memref<128x128xbf16, #tpu.memory_space<vmem>>, vector<128x128xbf16>
    %cst = arith.constant dense<0.000000e+00> : vector<128x128xf32>
    %3 = tpu.matmul %1, %2, %cst {dimension_numbers = #tpu.dot_dimension_numbers<[1], [0], [0], [1], [0, 0, 1, 1], [], []>} : vector<128x128xbf16>, vector<128x128xbf16>, vector<128x128xf32> -> vector<128x128xf32>
    %c0_3 = arith.constant 0 : index
    %c0_4 = arith.constant 0 : index
    %4 = vector.load %arg3[%c0_3, %c0_4] : memref<1x128xf32, #tpu.memory_space<vmem>>, vector<1x128xf32>
    %5 = vector.broadcast %4 : vector<1x128xf32> to vector<128x128xf32>
    %6 = arith.addf %3, %5 : vector<128x128xf32>
    %c0_5 = arith.constant 0 : index
    %c0_6 = arith.constant 0 : index
    %7 = vector.load %arg4[%c0_5, %c0_6] : memref<128x128xf32, #tpu.memory_space<vmem>>, vector<128x128xf32>
    tpu.vector_store %arg4[%c0_5, %c0_6], %6 {strides = array<i32>} : memref<128x128xf32, #tpu.memory_space<vmem>>, vector<128x128xf32>,
    return
  }
  func.func @transform_0(%arg0: i32) -> (i32, i32) {
    %c0_i32 = arith.constant 0 : i32
    %c0_i32_0 = arith.constant 0 : i32
    return %arg0, %c0_i32 : i32, i32
  }
  func.func @transform_1(%arg0: i32) -> (i32, i32) {
    %c0_i32 = arith.constant 0 : i32
    %c0_i32_0 = arith.constant 0 : i32
    %c0_i32_1 = arith.constant 0 : i32
    return %c0_i32, %c0_i32_0 : i32, i32
  }
  func.func @transform_2(%arg0: i32) -> (i32, i32) {
    %c0_i32 = arith.constant 0 : i32
    %c0_i32_0 = arith.constant 0 : i32
    %c0_i32_1 = arith.constant 0 : i32
    return %c0_i32, %c0_i32_0 : i32, i32
  }
  func.func @transform_3(%arg0: i32) -> (i32, i32) {
    %c0_i32 = arith.constant 0 : i32
    %c0_i32_0 = arith.constant 0 : i32
    return %arg0, %c0_i32 : i32, i32
  }
}

</mosaic_0001>

<bundles_post_ra>
// kernel: tpu_custom_call.1
= control target key start
LH: loop header
LB: loop body
LE: loop exit
PB: predicated region body
PF: predicated region fallthrough
CT: control target
= control target key end

     0   :  { %8 = vsyncpa [#allocation3], 0  ;;  %s439_s0 = inlined_call_operand.hbm [shape: s8[128,128], index: 0, kind: input, shape index: {}]   ;;  %s440_s1 = inlined_call_operand.hbm [shape: bf16[128,128], index: 1, kind: input, shape index: {}]   ;;  %s441_s2 = inlined_call_operand.vmem [shape: f32[1,128], index: 2, kind: input, shape index: {}]   ;;  %s442_s3 = inlined_call_operand.hbm [shape: f32[128,128], index: 3, kind: output, shape index: {}]  }
   0x1   :  { %9 = vsyncpa [#allocation6], 0 }
   0x2   :  { %10 = vsyncpa [#allocation4], 0  ;;  %s15_s14 = sshll.u32 %s439_s0, 4  ;;  %s394_s15 = smov [#allocation2]   ;;  %s16_s14 = int_to_ptr.hbm [resolvable:$true] %s15_s14 }
   0x3   :  { %s17_s16 = sshll.u32 %s394_s15, 4  ;;  %s28_s19 = sshll.u32 %s440_s1, 4  ;;  %s18_s16 = int_to_ptr.vmem [resolvable:$true] %s17_s16  ;;  %s29_s19 = int_to_ptr.hbm [resolvable:$true] %s28_s19 }
   0x4   :  { %s395_s20 = smov 128   ;;  %s396_s21 = smov 8  }
   0x5   :  { %23 = dma.hbm_to_vmem [thread:$0]  %s16_s14, 512, %s18_s16, [#allocation3], %s395_s20, %s395_s20, %s396_s21  }
   0x6   :  { %s397_s22 = smov [#allocation5]   ;;  %s398_s24 = smov 64  }
   0x7   :  { %s30_s23 = sshll.u32 %s397_s22, 4  ;;  %s399_s0 = smov 4   ;;  %s31_s23 = int_to_ptr.vmem [resolvable:$true] %s30_s23 }
   0x8   :  { %36 = dma.hbm_to_vmem [thread:$0]  %s29_s19, 1024, %s31_s23, [#allocation6], %s398_s24, %s398_s24, %s399_s0  }
   0x9   :  { %388 = dma.done.wait [#allocation3], 512  }
   0xa   :  { %389 = vsyncadd [#allocation3], 4294966784 }
   0xb   :  { %390 = dma.done.wait [#allocation6], 1024  }
   0xc   :  { %391 = vsyncadd [#allocation6], 4294966272  ;;  %v283_v0 = vld [vmem:[#allocation5 + $0x38] sm:$0xff]  ;;  %v282_v1 = vld [vmem:[#allocation5 + $0x30] sm:$0xff]  ;;  %s230_s29 = sshll.u32 %s442_s3, 4  ;;  %s231_s29 = int_to_ptr.hbm [resolvable:$true] %s230_s29 }
   0xd   :  { %159 = vmatpush.bf16.msra.mxu0 %v283_v0  ;;  %284 = vmatpush.bf16.msra.mxu1 %v283_v0  ;;  %v281_v2 = vld [vmem:[#allocation5 + $0x28] sm:$0xff]  ;;  %v280_v3 = vld [vmem:[#allocation5 + $0x20] sm:$0xff]  ;;  %v279_v4 = vld [vmem:[#allocation5 + $0x18] sm:$0xff] }
   0xe   :  { %285 = vmatpush.bf16.msra.mxu2 %v283_v0  ;;  %286 = vmatpush.bf16.msra.mxu3 %v283_v0  ;;  %v278_v5 = vld [vmem:[#allocation5 + $0x10] sm:$0xff]  ;;  %v47_v6 = vld [vmem:[#allocation2] sm:$0xff]  ;;  %v48_v7 = vld [vmem:[#allocation2 + $0x8] sm:$0xff] }
   0xf   :  { %v49_v8 = vld [vmem:[#allocation2 + $0x10] sm:$0xff]  ;;  %v50_v9 = vld [vmem:[#allocation2 + $0x18] sm:$0xff]  ;;  %v51_v10 = vunpack.c.0.s8 %v47_v6  ;;  %v52_v11 = vunpack.c.1.s8 %v47_v6  ;;  %v55_v12 = vunpack.c.0.s8 %v48_v7  ;;  %v56_v13 = vunpack.c.1.s8 %v48_v7  ;;  %v277_v14 = vld [vmem:[#allocation5 + $0x8] sm:$0xff] }
  0x10   :  { %v59_v15 = vunpack.c.0.s8 %v49_v8  ;;  %v60_v16 = vunpack.c.1.s8 %v49_v8  ;;  %v63_v17 = vunpack.c.0.s8 %v50_v9  ;;  %v64_v18 = vunpack.c.1.s8 %v50_v9  ;;  %v276_v23 = vld [vmem:[#allocation5] sm:$0xff] }
  0x11   :  { %160 = vmatpush.bf16.msra.mxu0 %v282_v1  ;;  %287 = vmatpush.bf16.msra.mxu1 %v282_v1  ;;  %v67_v19 = vcvt.s32.f32 %v51_v10  ;;  %v68_v20 = vcvt.s32.f32 %v52_v11  ;;  %v71_v21 = vcvt.s32.f32 %v55_v12  ;;  %v72_v22 = vcvt.s32.f32 %v56_v13  ;;  %v315_v52 = vld [vmem:[%s441_s2] ss:$0 sm:$0xff]  ;;  %s400_s2 = smov [#allocation7]  }
  0x12   :  { %288 = vmatpush.bf16.msra.mxu2 %v282_v1  ;;  %289 = vmatpush.bf16.msra.mxu3 %v282_v1  ;;  %v75_v24 = vcvt.s32.f32 %v59_v15  ;;  %v76_v25 = vcvt.s32.f32 %v60_v16  ;;  %v79_v26 = vcvt.s32.f32 %v63_v17  ;;  %v80_v27 = vcvt.s32.f32 %v64_v18  ;;  %s228_s26 = sshll.u32 %s400_s2, 4  ;;  %s229_s26 = int_to_ptr.vmem [resolvable:$true] %s228_s26 }
  0x13   :  { %v83_v28 = vpack.c.bf16 %v68_v20, %v67_v19  ;;  %v85_v29 = vpack.c.bf16 %v72_v22, %v71_v21  ;;  %v53_v32 = vunpack.c.2.s8 %v47_v6  ;;  %v54_v33 = vunpack.c.3.s8 %v47_v6 }
  0x14   :  { %v87_v30 = vpack.c.bf16 %v76_v25, %v75_v24  ;;  %v89_v31 = vpack.c.bf16 %v80_v27, %v79_v26  ;;  %v57_v34 = vunpack.c.2.s8 %v48_v7  ;;  %v58_v35 = vunpack.c.3.s8 %v48_v7 }
  0x15   :  { %161 = vmatpush.bf16.msra.mxu0 %v281_v2  ;;  %290 = vmatpush.bf16.msra.mxu1 %v281_v2  ;;  %v61_v36 = vunpack.c.2.s8 %v49_v8  ;;  %v62_v37 = vunpack.c.3.s8 %v49_v8  ;;  %v65_v38 = vunpack.c.2.s8 %v50_v9  ;;  %v66_v39 = vunpack.c.3.s8 %v50_v9 }
  0x16   :  { %291 = vmatpush.bf16.msra.mxu2 %v281_v2  ;;  %292 = vmatpush.bf16.msra.mxu3 %v281_v2  ;;  %v69_v40 = vcvt.s32.f32 %v53_v32  ;;  %v70_v41 = vcvt.s32.f32 %v54_v33  ;;  %v73_v42 = vcvt.s32.f32 %v57_v34  ;;  %v74_v43 = vcvt.s32.f32 %v58_v35 }
  0x17   :  { %v77_v44 = vcvt.s32.f32 %v61_v36  ;;  %v78_v45 = vcvt.s32.f32 %v62_v37  ;;  %v81_v46 = vcvt.s32.f32 %v65_v38  ;;  %v82_v47 = vcvt.s32.f32 %v66_v39 }
  0x18   :  { %v84_v48 = vpack.c.bf16 %v70_v41, %v69_v40  ;;  %v86_v49 = vpack.c.bf16 %v74_v43, %v73_v42 }
  0x19   :  { %162 = vmatpush.bf16.msra.mxu0 %v280_v3  ;;  %293 = vmatpush.bf16.msra.mxu1 %v280_v3  ;;  %v88_v50 = vpack.c.bf16 %v78_v45, %v77_v44  ;;  %v90_v51 = vpack.c.bf16 %v82_v47, %v81_v46 }
  0x1a   :  { %294 = vmatpush.bf16.msra.mxu2 %v280_v3  ;;  %295 = vmatpush.bf16.msra.mxu3 %v280_v3 }
  0x1d   :  { %163 = vmatpush.bf16.msra.mxu0 %v279_v4  ;;  %296 = vmatpush.bf16.msra.mxu1 %v279_v4 }
  0x1e   :  { %297 = vmatpush.bf16.msra.mxu2 %v279_v4  ;;  %298 = vmatpush.bf16.msra.mxu3 %v279_v4 }
  0x21   :  { %164 = vmatpush.bf16.msra.mxu0 %v278_v5  ;;  %299 = vmatpush.bf16.msra.mxu1 %v278_v5 }
  0x22   :  { %300 = vmatpush.bf16.msra.mxu2 %v278_v5  ;;  %301 = vmatpush.bf16.msra.mxu3 %v278_v5 }
  0x25   :  { %165 = vmatpush.bf16.msra.mxu0 %v277_v14  ;;  %302 = vmatpush.bf16.msra.mxu1 %v277_v14 }
  0x26   :  { %303 = vmatpush.bf16.msra.mxu2 %v277_v14  ;;  %304 = vmatpush.bf16.msra.mxu3 %v277_v14 }
  0x29   :  { %166 = vmatpush.bf16.msra.mxu0 %v276_v23  ;;  %305 = vmatpush.bf16.msra.mxu1 %v276_v23 }
  0x2a   :  { %306 = vmatpush.bf16.msra.mxu2 %v276_v23  ;;  %307 = vmatpush.bf16.msra.mxu3 %v276_v23 }
  0x2c   :  { %167 = vmatmul.bf16.vlgmr.msra.gmra.mxu0 %v83_v28  ;;  %177 = vmatmul.bf16.vlgmr.msra.gmra.mxu1 %v85_v29 }
  0x2d   :  { %187 = vmatmul.bf16.vlgmr.msra.gmra.mxu2 %v87_v30  ;;  %197 = vmatmul.bf16.vlgmr.msra.gmra.mxu3 %v89_v31 }
  0x3c   :  { %172 = vmatmul.bf16.gmra.mxu0 %v84_v48  ;;  %182 = vmatmul.bf16.gmra.mxu1 %v86_v49 }
  0x3d   :  { %192 = vmatmul.bf16.gmra.mxu2 %v88_v50  ;;  %202 = vmatmul.bf16.gmra.mxu3 %v90_v51 }
  0xa9   :  { %v168_v53 = vpop.f32.mrf.mxu0  ;;  %v178_v54 = vpop.f32.mrf.mxu1 }
  0xaa   :  { %v169_v55 = vadd.f32 %v315_v52, %v168_v53  ;;  %v179_v56 = vadd.f32 %v315_v52, %v178_v54 }
  0xac   :  { %208 = vst [vmem:[#allocation7] sm:$0xff] %v169_v55 }
  0xad   :  { %212 = vst [vmem:[#allocation7 + $0x20] sm:$0xff] %v179_v56 }
  0xb0   :  { %v188_v57 = vpop.f32.mrf.mxu2  ;;  %v198_v58 = vpop.f32.mrf.mxu3 }
  0xb1   :  { %v189_v59 = vadd.f32 %v315_v52, %v188_v57  ;;  %v199_v60 = vadd.f32 %v315_v52, %v198_v58  ;;  %v170_v61 = vpop.f32.mrf.mxu0  ;;  %v180_v62 = vpop.f32.mrf.mxu1 }
  0xb2   :  { %v171_v63 = vadd.f32 %v315_v52, %v170_v61  ;;  %v181_v0 = vadd.f32 %v315_v52, %v180_v62 }
  0xb3   :  { %216 = vst [vmem:[#allocation7 + $0x40] sm:$0xff] %v189_v59 }
  0xb4   :  { %220 = vst [vmem:[#allocation7 + $0x60] sm:$0xff] %v199_v60 }
  0xb5   :  { %209 = vst [vmem:[#allocation7 + $0x8] sm:$0xff] %v171_v63 }
  0xb6   :  { %213 = vst [vmem:[#allocation7 + $0x28] sm:$0xff] %v181_v0 }
  0xb8   :  { %v190_v1 = vpop.f32.mrf.mxu2  ;;  %v200_v2 = vpop.f32.mrf.mxu3 }
  0xb9   :  { %v191_v3 = vadd.f32 %v315_v52, %v190_v1  ;;  %v201_v4 = vadd.f32 %v315_v52, %v200_v2  ;;  %v173_v5 = vpop.f32.mrf.mxu0  ;;  %v183_v6 = vpop.f32.mrf.mxu1 }
  0xba   :  { %v174_v7 = vadd.f32 %v315_v52, %v173_v5  ;;  %v184_v8 = vadd.f32 %v315_v52, %v183_v6 }
  0xbb   :  { %217 = vst [vmem:[#allocation7 + $0x48] sm:$0xff] %v191_v3 }
  0xbc   :  { %221 = vst [vmem:[#allocation7 + $0x68] sm:$0xff] %v201_v4 }
  0xbd   :  { %210 = vst [vmem:[#allocation7 + $0x10] sm:$0xff] %v174_v7 }
  0xbe   :  { %214 = vst [vmem:[#allocation7 + $0x30] sm:$0xff] %v184_v8 }
  0xc0   :  { %v193_v9 = vpop.f32.mrf.mxu2  ;;  %v203_v10 = vpop.f32.mrf.mxu3 }
  0xc1   :  { %v194_v11 = vadd.f32 %v315_v52, %v193_v9  ;;  %v204_v12 = vadd.f32 %v315_v52, %v203_v10  ;;  %v175_v13 = vpop.f32.mrf.mxu0  ;;  %v185_v14 = vpop.f32.mrf.mxu1 }
  0xc2   :  { %v176_v15 = vadd.f32 %v315_v52, %v175_v13  ;;  %v186_v16 = vadd.f32 %v315_v52, %v185_v14 }
  0xc3   :  { %218 = vst [vmem:[#allocation7 + $0x50] sm:$0xff] %v194_v11 }
  0xc4   :  { %222 = vst [vmem:[#allocation7 + $0x70] sm:$0xff] %v204_v12 }
  0xc5   :  { %211 = vst [vmem:[#allocation7 + $0x18] sm:$0xff] %v176_v15 }
  0xc6   :  { %215 = vst [vmem:[#allocation7 + $0x38] sm:$0xff] %v186_v16 }
  0xc8   :  { %v195_v17 = vpop.f32.mrf.mxu2  ;;  %v205_v18 = vpop.f32.mrf.mxu3 }
  0xc9   :  { %v196_v19 = vadd.f32 %v315_v52, %v195_v17  ;;  %v206_v20 = vadd.f32 %v315_v52, %v205_v18 }
  0xcb   :  { %219 = vst [vmem:[#allocation7 + $0x58] sm:$0xff] %v196_v19 }
  0xcc   :  { %223 = vst [vmem:[#allocation7 + $0x78] sm:$0xff] %v206_v20 }
  0xcd   :  { %236 = dma.vmem_to_hbm [thread:$0]  %s229_s26, 2048, %s231_s29, [#allocation4], %s395_s20, %s395_s20, %s396_s21  }
  0xce   :  { %392 = dma.done.wait [#allocation4], 2048  }
  0xcf   :  { %393 = vsyncadd [#allocation4], 4294965248 }
  0xd0   :  { %241 = vsyncpa [#allocation3], 1 }
  0xd1   :  { %242 = vsyncpa [#allocation6], 1 }
  0xd2   :  { %243 = vsyncpa [#allocation4], 1 }

</bundles_post_ra>
